<compile_context>
chip_gen: v5e
topology: v5e:2x2
jax: 0.10.0
libtpu: 0.0.40
codegen_flags: <defaults>
</compile_context>

<pallas_src>
import functools
import math

import jax
import jax.numpy as jnp
from jax.experimental import pallas as pl
from jax.experimental.pallas import tpu as pltpu


# ---------------------------------------------------------------------------
# Kernels
# ---------------------------------------------------------------------------
def _softmax_stats_kernel(x_ref, w_ref, b_ref, lse_ref, m_sc, l_sc):
    """Pass 1: online softmax statistics over streamed vocab tiles.

    Grid = (row_tiles, vocab_tiles); vocab axis last ("arbitrary").
    Running max / sum-exp live in VMEM scratch; the lse output block is
    resident across the vocab axis and written on the final vocab step.
    """
    j = pl.program_id(1)

    @pl.when(j == 0)
    def _init():
        m_sc[...] = jnp.full(m_sc.shape, -jnp.inf, dtype=m_sc.dtype)
        l_sc[...] = jnp.zeros(l_sc.shape, dtype=l_sc.dtype)

    # bf16 MXU matmul, f32 accumulation (inputs already bf16 from the wrapper).
    logits = jnp.dot(x_ref[...], w_ref[...], preferred_element_type=jnp.float32)
    logits = logits + b_ref[...]

    m_prev = m_sc[...]
    m_new = jnp.maximum(m_prev, jnp.max(logits, axis=-1, keepdims=True))
    l_sc[...] = jnp.exp(m_prev - m_new) * l_sc[...] + jnp.sum(
        jnp.exp(logits - m_new), axis=-1, keepdims=True
    )
    m_sc[...] = m_new

    @pl.when(j == pl.num_programs(1) - 1)
    def _finalize():
        lse_ref[...] = m_sc[...] + jnp.log(l_sc[...])


def _softmax_emit_kernel(x_ref, w_ref, b_ref, lse_ref, o_ref):
    """Pass 2: recompute the logits tile and emit exp(logits - lse)."""
    logits = jnp.dot(x_ref[...], w_ref[...], preferred_element_type=jnp.float32)
    logits = logits + b_ref[...]
    o_ref[...] = jnp.exp(logits - lse_ref[...]).astype(o_ref.dtype)


# ---------------------------------------------------------------------------
# Helpers
# ---------------------------------------------------------------------------
def _round_up(v, m):
    return (v + m - 1) // m * m


_DEFAULT_VMEM_BYTES = 128 * 1024 * 1024


def _vmem_budget_bytes():
    """Generation-aware usable-VMEM budget (leave ~25% headroom for the
    compiler): ~48 MiB on v7x (64 MiB physical), ~96 MiB on v5e/v6e."""
    cap = _DEFAULT_VMEM_BYTES
    try:
        info_fn = getattr(pltpu, "get_tpu_info", None)
        if info_fn is not None:
            cap = int(getattr(info_fn(), "vmem_capacity_bytes", cap) or cap)
    except Exception:
        cap = _DEFAULT_VMEM_BYTES
    return int(cap * 3 // 4)


def _estimate_vmem(tm, tn, d_model, x_bytes, w_bytes, out_bytes):
    """Double-buffered block footprint (pass 2 dominates) + scratch."""
    x_blk = tm * d_model * x_bytes
    w_blk = d_model * tn * w_bytes
    b_blk = tn * 4
    o_blk = tm * tn * out_bytes
    stat_blk = tm * 4
    return 2 * (x_blk + w_blk + b_blk + o_blk + stat_blk) + 2 * stat_blk


# ---------------------------------------------------------------------------
# Parameter preparation (one time, NOT in the per-call hot path)
# ---------------------------------------------------------------------------
def prepare_generator_params(weight, bias, *, weight_dtype=jnp.bfloat16,
                             pad_vocab_to=1024):
    """PyTorch Linear stores weight [vocab, d_model]; keep it transposed to
    [d_model, vocab_pad] (vocab on the lane axis), cast to bf16 and pad the
    vocab axis to a multiple of `pad_vocab_to` (zero weight columns, -inf bias
    so padded probabilities are exactly 0).  Returns (w_t, bias_row, vocab).
    """
    w_t = jnp.asarray(weight).T.astype(weight_dtype)  # [d_model, vocab]
    b = jnp.asarray(bias).astype(jnp.float32)
    vocab = w_t.shape[1]
    pad_to = _round_up(max(int(pad_vocab_to), 128), 128)
    vocab_pad = _round_up(max(vocab, 128), pad_to)
    if vocab_pad != vocab:
        w_t = jnp.pad(w_t, ((0, 0), (0, vocab_pad - vocab)))
        b = jnp.pad(b, (0, vocab_pad - vocab), constant_values=float("-inf"))
    return w_t, b.reshape(1, vocab_pad), vocab


# ---------------------------------------------------------------------------
# Forward
# ---------------------------------------------------------------------------
def generator_forward(x, w_t, bias_row, vocab=None, *, tile_m=512,
                      tile_n=1024, out_dtype=None):
    """x: [..., d_model]; w_t: [d_model, vocab_pad] (pre-transposed, padded);
    bias_row: [1, vocab_pad]; vocab: true (unpadded) vocab size."""
    d_model = x.shape[-1]
    kd, vocab_pad = w_t.shape
    assert kd == d_model, "weight must be pre-transposed to [d_model, vocab]"
    assert vocab_pad % 128 == 0, "use prepare_generator_params (padded vocab)"
    if vocab is None:
        vocab = vocab_pad
    out_dtype = jnp.dtype(x.dtype if out_dtype is None else out_dtype)

    lead_shape = x.shape[:-1]
    x2 = x.reshape(-1, d_model).astype(jnp.bfloat16)  # cast ONCE in the wrapper
    n_rows = x2.shape[0]

    # --- tile selection (VMEM-budget aware) ---------------------------------
    budget = _vmem_budget_bytes()
    x_bytes = x2.dtype.itemsize
    w_bytes = w_t.dtype.itemsize
    o_bytes = out_dtype.itemsize

    tm = max(8, (int(tile_m) // 8) * 8)
    tm = min(tm, _round_up(n_rows, 8))

    tn = max(128, (int(tile_n) // 128) * 128)
    tn = min(tn, vocab_pad)
    while vocab_pad % tn:          # snap to a divisor of the padded vocab
        tn -= 128

    while _estimate_vmem(tm, tn, d_model, x_bytes, w_bytes, o_bytes) > budget and tn > 128:
        tn = max(128, ((tn // 2) // 128) * 128)
        while vocab_pad % tn:
            tn -= 128
    while _estimate_vmem(tm, tn, d_model, x_bytes, w_bytes, o_bytes) > budget and tm > 8:
        tm = max(8, ((tm // 2) // 8) * 8)

    n_pad = _round_up(n_rows, tm)
    if n_pad != n_rows:
        # Padded rows compute softmax(bias); sliced off below.
        x2 = jnp.pad(x2, ((0, n_pad - n_rows), (0, 0)))

    est = _estimate_vmem(tm, tn, d_model, x_bytes, w_bytes, o_bytes)
    vmem_limit = int(min(budget, max(int(est * 1.25), 16 * 1024 * 1024)))

    row_tiles = n_pad // tm
    vocab_tiles = vocab_pad // tn

    # --- Pass 1: online softmax statistics -> lse ----------------------------
    lse = pl.pallas_call(
        _softmax_stats_kernel,
        out_shape=jax.ShapeDtypeStruct((n_pad, 1), jnp.float32),
        grid_spec=pltpu.PrefetchScalarGridSpec(
            num_scalar_prefetch=0,
            grid=(row_tiles, vocab_tiles),
            in_specs=[
                pl.BlockSpec((tm, d_model), lambda i, j: (i, 0)),
                pl.BlockSpec((d_model, tn), lambda i, j: (0, j)),
                pl.BlockSpec((1, tn), lambda i, j: (0, j)),
            ],
            out_specs=pl.BlockSpec((tm, 1), lambda i, j: (i, 0)),
            scratch_shapes=[
                pltpu.VMEM((tm, 1), jnp.float32),  # running max
                pltpu.VMEM((tm, 1), jnp.float32),  # running sum-exp
            ],
        ),
        compiler_params=pltpu.CompilerParams(
            dimension_semantics=("parallel", "arbitrary"),
            vmem_limit_bytes=vmem_limit,
        ),
    )(x2, w_t, bias_row)

    # --- Pass 2: recompute logits, emit exp(logits - lse) --------------------
    # Keep the larger operand resident across the inner axis: when the weight
    # slab (d_model x tn) outweighs the x tile (tm x d_model), put vocab on the
    # outer axis so the full weight streams from HBM exactly once.
    if tn * w_bytes >= tm * x_bytes:
        grid2 = (vocab_tiles, row_tiles)
        in_specs2 = [
            pl.BlockSpec((tm, d_model), lambda j, i: (i, 0)),
            pl.BlockSpec((d_model, tn), lambda j, i: (0, j)),
            pl.BlockSpec((1, tn), lambda j, i: (0, j)),
            pl.BlockSpec((tm, 1), lambda j, i: (i, 0)),
        ]
        out_spec2 = pl.BlockSpec((tm, tn), lambda j, i: (i, j))
    else:
        grid2 = (row_tiles, vocab_tiles)
        in_specs2 = [
            pl.BlockSpec((tm, d_model), lambda i, j: (i, 0)),
            pl.BlockSpec((d_model, tn), lambda i, j: (0, j)),
            pl.BlockSpec((1, tn), lambda i, j: (0, j)),
            pl.BlockSpec((tm, 1), lambda i, j: (i, 0)),
        ]
        out_spec2 = pl.BlockSpec((tm, tn), lambda i, j: (i, j))

    out = pl.pallas_call(
        _softmax_emit_kernel,
        out_shape=jax.ShapeDtypeStruct((n_pad, vocab_pad), out_dtype),
        grid_spec=pltpu.PrefetchScalarGridSpec(
            num_scalar_prefetch=0,
            grid=grid2,
            in_specs=in_specs2,
            out_specs=out_spec2,
        ),
        compiler_params=pltpu.CompilerParams(
            dimension_semantics=("parallel", "parallel"),
            vmem_limit_bytes=vmem_limit,
        ),
    )(x2, w_t, bias_row, lse)

    out = out[:n_rows, :vocab]
    return out.reshape(*lead_shape, vocab)


# ---------------------------------------------------------------------------
# Demo / self-check
# ---------------------------------------------------------------------------
if __name__ == "__main__":
    key = jax.random.PRNGKey(0)
    k_x, k_w, k_b = jax.random.split(key, 3)

    # Small shapes; vocab deliberately NOT a multiple of 128 to exercise the
    # padded-vocab path (-inf bias -> exactly-zero padded probabilities).
    batch, seq, d_model, vocab = 2, 8, 32, 500

    x = jax.random.normal(k_x, (batch, seq, d_model), dtype=jnp.float32)
    bound = 1.0 / math.sqrt(d_model)
    # PyTorch Linear layout: weight [vocab, d_model], bias [vocab]
    weight = jax.random.uniform(k_w, (vocab, d_model), jnp.float32, -bound, bound)
    bias = jax.random.uniform(k_b, (vocab,), jnp.float32, -bound, bound)

    # One-time parameter prep (transpose + bf16 cast + vocab pad) outside the
    # hot path.  Small pad_vocab_to keeps the demo's padded vocab at 512.
    w_t, b_row, vocab_true = prepare_generator_params(weight, bias,
                                                      pad_vocab_to=128)

    # Small tiles so the demo exercises multi-step row and vocab grids
    # (row grid = 2, vocab grid = 4) and the vocab-outer pass-2 ordering.
    fwd = jax.jit(functools.partial(generator_forward, vocab=vocab_true,
                                    tile_m=8, tile_n=128))
    out = jax.block_until_ready(fwd(x, w_t, b_row))
    assert out.shape == (batch, seq, vocab)

    # Reference with the same bf16-input / f32-accumulate matmul semantics.
    x_bf = x.astype(jnp.bfloat16).astype(jnp.float32)
    w_bf = w_t[:, :vocab_true].astype(jnp.float32)
    ref = jax.nn.softmax(
        jnp.einsum("bsd,dv->bsv", x_bf, w_bf) + bias, axis=-1)
    assert jnp.allclose(out, ref, atol=2e-3), float(jnp.max(jnp.abs(out - ref)))

    # Exact lse normalization -> rows sum to 1 tightly.
    assert jnp.allclose(jnp.sum(out, axis=-1), 1.0, atol=1e-3)

    # Looser check against exact f32 PyTorch-module semantics (bf16 weights
    # intentionally differ from the f32 nn.Linear).
    ref_f32 = jax.nn.softmax(jnp.einsum("bsd,vd->bsv", x, weight) + bias, axis=-1)
    assert jnp.allclose(out, ref_f32, atol=1e-2)

    print("KERNEL_OK")
</pallas_src>

<mosaic_0001>
module attributes {stable_mosaic.version = 11 : i64} {
  func.func @_softmax_stats_kernel(%arg0: i32, %arg1: i32, %arg2: memref<8x32xbf16, #tpu.memory_space<vmem>>, %arg3: memref<32x128xbf16, #tpu.memory_space<vmem>>, %arg4: memref<1x128xf32, #tpu.memory_space<vmem>>, %arg5: memref<8x1xf32, #tpu.memory_space<vmem>>, %arg6: memref<8x1xf32, #tpu.memory_space<vmem>>, %arg7: memref<8x1xf32, #tpu.memory_space<vmem>>) attributes {dimension_semantics = [#tpu.dimension_semantics<parallel>, #tpu.dimension_semantics<arbitrary>], iteration_bounds = array<i64: 2, 4>, scalar_prefetch = 0 : i64, scratch_operands = 2 : i64, tpu.core_type = #tpu.core_type<tc>, window_params = [{transform_indices = @transform_0, window_bounds = array<i64: 8, 32>}, {transform_indices = @transform_1, window_bounds = array<i64: 32, 128>}, {transform_indices = @transform_2, window_bounds = array<i64: 1, 128>}, {transform_indices = @transform_3, window_bounds = array<i64: 8, 1>}]} {
    %c0_i32 = arith.constant 0 : i32
    %0 = arith.cmpi eq, %arg1, %c0_i32 : i32
    %1 = arith.extui %0 : i1 to i32
    %c0_i32_0 = arith.constant 0 : i32
    %2 = arith.cmpi ne, %1, %c0_i32_0 : i32
    scf.if %2 {
      %cst_17 = arith.constant 0xFF800000 : f32
      %28 = vector.broadcast %cst_17 : f32 to vector<8x1xf32>
      %c0_18 = arith.constant 0 : index
      %c0_19 = arith.constant 0 : index
      %29 = vector.load %arg6[%c0_18, %c0_19] : memref<8x1xf32, #tpu.memory_space<vmem>>, vector<8x1xf32>
      tpu.vector_store %arg6[%c0_18, %c0_19], %28 {strides = array<i32>} : memref<8x1xf32, #tpu.memory_space<vmem>>, vector<8x1xf32>,
      %cst_20 = arith.constant 0.000000e+00 : f32
      %30 = vector.broadcast %cst_20 : f32 to vector<8x1xf32>
      %c0_21 = arith.constant 0 : index
      %c0_22 = arith.constant 0 : index
      %31 = vector.load %arg7[%c0_21, %c0_22] : memref<8x1xf32, #tpu.memory_space<vmem>>, vector<8x1xf32>
      tpu.vector_store %arg7[%c0_21, %c0_22], %30 {strides = array<i32>} : memref<8x1xf32, #tpu.memory_space<vmem>>, vector<8x1xf32>,
    } else {
    }
    %c0 = arith.constant 0 : index
    %c0_1 = arith.constant 0 : index
    %3 = vector.load %arg2[%c0, %c0_1] : memref<8x32xbf16, #tpu.memory_space<vmem>>, vector<8x32xbf16>
    %c0_2 = arith.constant 0 : index
    %c0_3 = arith.constant 0 : index
    %4 = vector.load %arg3[%c0_2, %c0_3] : memref<32x128xbf16, #tpu.memory_space<vmem>>, vector<32x128xbf16>
    %cst = arith.constant dense<0.000000e+00> : vector<8x128xf32>
    %5 = tpu.matmul %3, %4, %cst {dimension_numbers = #tpu.dot_dimension_numbers<[1], [0], [0], [1], [0, 0, 1, 1], [], []>} : vector<8x32xbf16>, vector<32x128xbf16>, vector<8x128xf32> -> vector<8x128xf32>
    %c0_4 = arith.constant 0 : index
    %c0_5 = arith.constant 0 : index
    %6 = vector.load %arg4[%c0_4, %c0_5] : memref<1x128xf32, #tpu.memory_space<vmem>>, vector<1x128xf32>
    %7 = vector.broadcast %6 : vector<1x128xf32> to vector<8x128xf32>
    %8 = arith.addf %5, %7 : vector<8x128xf32>
    %c0_6 = arith.constant 0 : index
    %c0_7 = arith.constant 0 : index
    %9 = vector.load %arg6[%c0_6, %c0_7] : memref<8x1xf32, #tpu.memory_space<vmem>>, vector<8x1xf32>
    %cst_8 = arith.constant dense<0xFF800000> : vector<8xf32>
    %10 = vector.multi_reduction <maximumf>, %8, %cst_8 [1] : vector<8x128xf32> to vector<8xf32>
    %11 = vector.shape_cast %10 : vector<8xf32> to vector<8x1xf32>
    %12 = arith.maximumf %9, %11 : vector<8x1xf32>
    %13 = arith.subf %9, %12 : vector<8x1xf32>
    %14 = math.exp %13 : vector<8x1xf32>
    %c0_9 = arith.constant 0 : index
    %c0_10 = arith.constant 0 : index
    %15 = vector.load %arg7[%c0_9, %c0_10] : memref<8x1xf32, #tpu.memory_space<vmem>>, vector<8x1xf32>
    %16 = arith.mulf %14, %15 : vector<8x1xf32>
    %17 = vector.broadcast %12 : vector<8x1xf32> to vector<8x128xf32>
    %18 = arith.subf %8, %17 : vector<8x128xf32>
    %19 = math.exp %18 : vector<8x128xf32>
    %cst_11 = arith.constant dense<0.000000e+00> : vector<8xf32>
    %20 = vector.multi_reduction <add>, %19, %cst_11 [1] : vector<8x128xf32> to vector<8xf32>
    %21 = vector.shape_cast %20 : vector<8xf32> to vector<8x1xf32>
    %22 = arith.addf %16, %21 : vector<8x1xf32>
    %c0_12 = arith.constant 0 : index
    %c0_13 = arith.constant 0 : index
    %23 = vector.load %arg7[%c0_12, %c0_13] : memref<8x1xf32, #tpu.memory_space<vmem>>, vector<8x1xf32>
    tpu.vector_store %arg7[%c0_12, %c0_13], %22 {strides = array<i32>} : memref<8x1xf32, #tpu.memory_space<vmem>>, vector<8x1xf32>,
    %c0_14 = arith.constant 0 : index
    %c0_15 = arith.constant 0 : index
    %24 = vector.load %arg6[%c0_14, %c0_15] : memref<8x1xf32, #tpu.memory_space<vmem>>, vector<8x1xf32>
    tpu.vector_store %arg6[%c0_14, %c0_15], %12 {strides = array<i32>} : memref<8x1xf32, #tpu.memory_space<vmem>>, vector<8x1xf32>,
    %c3_i32 = arith.constant 3 : i32
    %25 = arith.cmpi eq, %arg1, %c3_i32 : i32
    %26 = arith.extui %25 : i1 to i32
    %c0_i32_16 = arith.constant 0 : i32
    %27 = arith.cmpi ne, %26, %c0_i32_16 : i32
    scf.if %27 {
      %c0_17 = arith.constant 0 : index
      %c0_18 = arith.constant 0 : index
      %28 = vector.load %arg6[%c0_17, %c0_18] : memref<8x1xf32, #tpu.memory_space<vmem>>, vector<8x1xf32>
      %c0_19 = arith.constant 0 : index
      %c0_20 = arith.constant 0 : index
      %29 = vector.load %arg7[%c0_19, %c0_20] : memref<8x1xf32, #tpu.memory_space<vmem>>, vector<8x1xf32>
      %30 = math.log %29 : vector<8x1xf32>
      %31 = arith.addf %28, %30 : vector<8x1xf32>
      %c0_21 = arith.constant 0 : index
      %c0_22 = arith.constant 0 : index
      %32 = vector.load %arg5[%c0_21, %c0_22] : memref<8x1xf32, #tpu.memory_space<vmem>>, vector<8x1xf32>
      tpu.vector_store %arg5[%c0_21, %c0_22], %31 {strides = array<i32>} : memref<8x1xf32, #tpu.memory_space<vmem>>, vector<8x1xf32>,
    } else {
    }
    return
  }
  func.func @transform_0(%arg0: i32, %arg1: i32) -> (i32, i32) {
    %c0_i32 = arith.constant 0 : i32
    %c0_i32_0 = arith.constant 0 : i32
    return %arg0, %c0_i32 : i32, i32
  }
  func.func @transform_1(%arg0: i32, %arg1: i32) -> (i32, i32) {
    %c0_i32 = arith.constant 0 : i32
    %c0_i32_0 = arith.constant 0 : i32
    return %c0_i32, %arg1 : i32, i32
  }
  func.func @transform_2(%arg0: i32, %arg1: i32) -> (i32, i32) {
    %c0_i32 = arith.constant 0 : i32
    %c0_i32_0 = arith.constant 0 : i32
    return %c0_i32, %arg1 : i32, i32
  }
  func.func @transform_3(%arg0: i32, %arg1: i32) -> (i32, i32) {
    %c0_i32 = arith.constant 0 : i32
    %c0_i32_0 = arith.constant 0 : i32
    return %arg0, %c0_i32 : i32, i32
  }
}

module attributes {stable_mosaic.version = 11 : i64} {
  func.func @_softmax_emit_kernel(%arg0: i32, %arg1: i32, %arg2: memref<8x32xbf16, #tpu.memory_space<vmem>>, %arg3: memref<32x128xbf16, #tpu.memory_space<vmem>>, %arg4: memref<1x128xf32, #tpu.memory_space<vmem>>, %arg5: memref<8x1xf32, #tpu.memory_space<vmem>>, %arg6: memref<8x128xf32, #tpu.memory_space<vmem>>) attributes {dimension_semantics = [#tpu.dimension_semantics<parallel>, #tpu.dimension_semantics<parallel>], iteration_bounds = array<i64: 4, 2>, scalar_prefetch = 0 : i64, scratch_operands = 0 : i64, tpu.core_type = #tpu.core_type<tc>, window_params = [{transform_indices = @transform_0, window_bounds = array<i64: 8, 32>}, {transform_indices = @transform_1, window_bounds = array<i64: 32, 128>}, {transform_indices = @transform_2, window_bounds = array<i64: 1, 128>}, {transform_indices = @transform_3, window_bounds = array<i64: 8, 1>}, {transform_indices = @transform_4, window_bounds = array<i64: 8, 128>}]} {
    %c0 = arith.constant 0 : index
    %c0_0 = arith.constant 0 : index
    %0 = vector.load %arg2[%c0, %c0_0] : memref<8x32xbf16, #tpu.memory_space<vmem>>, vector<8x32xbf16>
    %c0_1 = arith.constant 0 : index
    %c0_2 = arith.constant 0 : index
    %1 = vector.load %arg3[%c0_1, %c0_2] : memref<32x128xbf16, #tpu.memory_space<vmem>>, vector<32x128xbf16>
    %cst = arith.constant dense<0.000000e+00> : vector<8x128xf32>
    %2 = tpu.matmul %0, %1, %cst {dimension_numbers = #tpu.dot_dimension_numbers<[1], [0], [0], [1], [0, 0, 1, 1], [], []>} : vector<8x32xbf16>, vector<32x128xbf16>, vector<8x128xf32> -> vector<8x128xf32>
    %c0_3 = arith.constant 0 : index
    %c0_4 = arith.constant 0 : index
    %3 = vector.load %arg4[%c0_3, %c0_4] : memref<1x128xf32, #tpu.memory_space<vmem>>, vector<1x128xf32>
    %4 = vector.broadcast %3 : vector<1x128xf32> to vector<8x128xf32>
    %5 = arith.addf %2, %4 : vector<8x128xf32>
    %c0_5 = arith.constant 0 : index
    %c0_6 = arith.constant 0 : index
    %6 = vector.load %arg5[%c0_5, %c0_6] : memref<8x1xf32, #tpu.memory_space<vmem>>, vector<8x1xf32>
    %7 = vector.broadcast %6 : vector<8x1xf32> to vector<8x128xf32>
    %8 = arith.subf %5, %7 : vector<8x128xf32>
    %9 = math.exp %8 : vector<8x128xf32>
    %c0_7 = arith.constant 0 : index
    %c0_8 = arith.constant 0 : index
    %10 = vector.load %arg6[%c0_7, %c0_8] : memref<8x128xf32, #tpu.memory_space<vmem>>, vector<8x128xf32>
    tpu.vector_store %arg6[%c0_7, %c0_8], %9 {strides = array<i32>} : memref<8x128xf32, #tpu.memory_space<vmem>>, vector<8x128xf32>,
    return
  }
  func.func @transform_0(%arg0: i32, %arg1: i32) -> (i32, i32) {
    %c0_i32 = arith.constant 0 : i32
    %c0_i32_0 = arith.constant 0 : i32
    return %arg1, %c0_i32 : i32, i32
  }
  func.func @transform_1(%arg0: i32, %arg1: i32) -> (i32, i32) {
    %c0_i32 = arith.constant 0 : i32
    %c0_i32_0 = arith.constant 0 : i32
    return %c0_i32, %arg0 : i32, i32
  }
  func.func @transform_2(%arg0: i32, %arg1: i32) -> (i32, i32) {
    %c0_i32 = arith.constant 0 : i32
    %c0_i32_0 = arith.constant 0 : i32
    return %c0_i32, %arg0 : i32, i32
  }
  func.func @transform_3(%arg0: i32, %arg1: i32) -> (i32, i32) {
    %c0_i32 = arith.constant 0 : i32
    %c0_i32_0 = arith.constant 0 : i32
    return %arg1, %c0_i32 : i32, i32
  }
  func.func @transform_4(%arg0: i32, %arg1: i32) -> (i32, i32) {
    %c0_i32 = arith.constant 0 : i32
    return %arg1, %arg0 : i32, i32
  }
}

</mosaic_0001>

<bundles_post_ra>
// kernel: generator_forward.3
= control target key start
LH: loop header
LB: loop body
LE: loop exit
PB: predicated region body
PF: predicated region fallthrough
CT: control target
= control target key end

     0   :  { %9 = vsyncpa [#allocation3], 0  ;;  %s813_s0 = inlined_call_operand.vmem [shape: bf16[16,32], index: 0, kind: input, shape index: {}]   ;;  %s814_s1 = inlined_call_operand.hbm [shape: bf16[32,512], index: 1, kind: input, shape index: {}]   ;;  %s815_s2 = inlined_call_operand.vmem [shape: f32[1,512], index: 2, kind: input, shape index: {}]   ;;  %s816_s3 = inlined_call_operand.vmem [shape: f32[16,1], index: 3, kind: input, shape index: {}]   ;;  %s817_s4 = inlined_call_operand.vmem [shape: f32[16,512], index: 4, kind: output, shape index: {}]  }
   0x1   :  { %11 = vsyncpa [#allocation3 + $0x1], 0  ;;  %s692_s15 = smov 0   ;;  %s694_s16 = smov 0  }
   0x2   :  { %s696_s17 = smov 0   ;;  %s698_s18 = smov 0  }
   0x3   :  { %s700_s19 = smov 0   ;;  %s702_s20 = smov 0  }
   0x4   :  { %s704_s21 = smov 0   ;;  %s706_s22 = smov 0  }
   0x5 LB: > { %s461_s23 = sadd.s32 4294967295, %s661_s22   ;;  %s26_s24 = sadd.s32 1, %s653_s20  ;;  %s661_s22 = sphi %s706_s22, %s17_s22   ;;  %s657_s21 = sphi %s704_s21, %s826_s21   ;;  %s653_s20 = sphi %s702_s20, %s825_s20   ;;  %s649_s19 = sphi %s700_s19, %s824_s19   ;;  %s645_s18 = sphi %s698_s18, %s823_s18   ;;  %s641_s17 = sphi %s696_s17, %s822_s17   ;;  %s637_s16 = sphi %s694_s16, %s821_s16   ;;  %s633_s15 = sphi %s692_s15, %s820_s15  }
   0x6   : > { %p27_p0 = scmp.ge.s32.totalorder %s26_s24, 2  ;;  %s29_s25 = sadd.s32 1, %s657_s21 }
   0x7   : > { %s62_s26 = sadd.s32 1, %s641_s17  ;;  %p69_p1 = scmp.ne.s32.totalorder %s641_s17, %s637_s16 }
   0x8   : > { %s828_s24 = smov (%p27_p0, %s26_s24), 0  ;;  %s830_s25 = smov (!%p27_p0, %s29_s25), %s657_s21 }
   0x9   : > { %p70_p2 = scmp.eq.s32.totalorder %s661_s22, 0  ;;  %p75_p3 = scmp.ne.s32.totalorder %s637_s16, %s633_s15 }
   0xa   : > { %p31_p4 = scmp.ge.s32.totalorder %s830_s25, 4  ;;  %p76_p5 = scmp.eq.s32.totalorder %s461_s23, 0 }
   0xb   : > { %p741_p6 = por %p70_p2, %p69_p1  ;;  %p492_p8 = scmp.lt.s32.totalorder %s661_s22, 8 }
   0xc   : > { %s832_s25 = smov (%p31_p4, %s830_s25), 0  ;;  %p747_p7 = por %p76_p5, %p75_p3 }
   0xd   : > { %s59_s29 = ssub.s32 %s657_s21, %s832_s25  ;;  %s186_s30 = sand.u32 1, %s641_s17  }
   0xe   : > { %p60_p9 = scmp.eq.s32.totalorder %s59_s29, 0  ;;  %s465_s5 = sshll.u32 %s186_s30, 4 }
   0xf   : > { %s466_s6 = sshll.u32 %s657_s21, 2  ;;  %s190_s12 = scalar_lea.vmem [#allocation2], %s465_s5 }
  0x10   : > { %s757_s7 = scalar_select %p60_p9, %s641_s17, %s62_s26  }
  0x11   : > { %s194_s10 = scalar_lea.hbm %s814_s1, %s466_s6  ;;  %s197_s13 = sshll.u32 %s190_s12, 4  ;;  %s198_s13 = int_to_ptr.vmem [resolvable:$true] %s197_s13 }
  0x12   : > { %s195_s11 = sshll.u32 %s194_s10, 4  ;;  %p489_p10 = pnand %p492_p8, %p741_p6  ;;  %s196_s11 = int_to_ptr.hbm [resolvable:$true] %s195_s11 }
  0x13   : > { %p467_p11 = scmp.ge.s32.totalorder %s661_s22, 1  ;;  %s187_s14 = scalar_lea.sflag [#allocation3], %s186_s30 }
  0x14   : > { %s663_s15 = smov 256   ;;  %s664_s23 = smov 64  }
  0x15   : > { %s665_s29 = smov 4   ;;  %p218_p12 = scmp.lt.s32.totalorder %s661_s22, 9 }
  0x16   : > { %491 = dma.hbm_to_vmem [thread:$0]  (!%p489_p10), %s196_s11, 256, %s198_s13, %s187_s14, %s663_s15, %s664_s23, %s665_s29  }
  0x17   : > { %p219_p13 = pnand %p467_p11, %p218_p12 }
  0x18   : > { %s224_s26 = sand.u32 (!%p219_p13), 1, %s637_s16  }
  0x19   : > { %222 = sbr.rel (%p219_p13) target bundleno = 179 (0xb3), region = 36  ;;  %s468_s6 = sshll.u32 (!%p219_p13), %s224_s26, 4 }
  0x1a   : > { %s225_s5 = scalar_lea.sflag (!%p219_p13), [#allocation3], %s224_s26  ;;  %s228_s8 = scalar_lea.vmem (!%p219_p13), [#allocation2], %s468_s6 }
  0x1e   : > { %628 = dma.done.wait (%p747_p7), %s225_s5, 256  }
  0x1f   : > { %630 = vsyncadd (%p747_p7), %s225_s5, 4294967040  ;;  %p268_p0 = scmp.lt.s32.totalorder %s645_s18, 1  ;;  %p272_p1 = scmp.lt.s32.totalorder %s649_s19, 3  ;;  %v666_v0 = vmov 0   ;;  %v485_v1 = vld [vmem:[%s228_s8 + $0x8] sm:$0xff]  ;;  %v484_v3 = vld [vmem:[%s228_s8] sm:$0xff] }
  0x20   : > { %561 = vset.pattern.permute.xlu0 %v666_v0  ;;  %319 = vmatpush.bf16.msra.mxu0 %v485_v1  ;;  %vm309_vm0 = vcmask 261120  }
  0x21   : > { %s834_s18 = smov (!%p268_p0, %s645_s18), 1  ;;  %s836_s19 = smov (!%p272_p1, %s649_s19), 3 }
  0x22   : > { %s469_s27 = sshll.u32 %s834_s18, 2  ;;  %s470_s30 = sshll.u32 %s834_s18, 3 }
  0x23   : > { %s284_s9 = sadd.s32 %s469_s27, %s836_s19  ;;  %s278_s12 = scalar_lea.vmem %s816_s3, %s470_s30 }
  0x24   : > { %s274_s14 = scalar_lea.vmem %s815_s2, %s836_s19  ;;  %v326_v2 = vld [vmem:[%s278_s12] sm:$0xff]  ;;  %s271_s29 = scalar_lea.vmem %s813_s0, %s469_s27  ;;  %320 = vmatpush.bf16.msra.mxu0 %v484_v3 }
  0x25   : > { %329 = vperm.xlu0 %561, %v326_v2   ;;  %v288_v4 = vld [vmem:[%s271_s29] sm:$0xf]  ;;  %s472_s18 = sshll.u32 %s284_s9, 3 }
  0x26   : > { %v562_v5 = vld [vmem:[%s274_s14] ss:$0 sm:$0xff]  ;;  %s286_s6 = scalar_lea.vmem %s817_s4, %s472_s18 }
  0x27   : > { %481 = vmatmul.msk.bf16.vlgmr.msra.gmra.mxu0 %vm309_vm0, %v288_v4 }
  0x97   : > { %v330_v7 = vpop.permute.xlu0 %329 }
  0xa4   : > { %v322_v6 = vpop.f32.mrf.mxu0 }
  0xa5   : > { %v323_v8 = vadd.f32 %v562_v5, %v322_v6 }
  0xa7   : > { %v332_v9 = vsub.f32 %v323_v8, %v330_v7 }
  0xa9   : > { %v333_v10 = vmul.f32 1.442695, %v332_v9 }
  0xab   : > { %563 = vpow2.f32 %v333_v10 }
  0xac   : > { %v324_v11 = vpop.f32.mrf.mxu0 }
  0xb1   : > { %v564_v12 = vpop.eup %563 }
  0xb2   : > { %335 = vst [vmem:[%s286_s6] sm:$0xff] %v564_v12 }
  0xb3 PF: > { %s17_s22 = sadd.s32 1, %s661_s22   ;;  %s820_s15 = smov %s637_s16 }
  0xb4   : > { %p14_p2 = scmp.ge.s32.totalorder %s17_s22, 10   ;;  %s821_s16 = smov %s641_s17 }
  0xb5   : > { %s822_s17 = smov %s757_s7  ;;  %s823_s18 = smov %s653_s20 }
  0xb6   : > { %s824_s19 = smov %s657_s21  ;;  %s825_s20 = smov %s828_s24 }
  0xb7   : > { %s826_s21 = smov %s832_s25  ;;  %16 = sbr.rel (!%p14_p2) target bundleno = 5 (0x5), region = 85 }
  0xbc   :  { %363 = vsyncpa [#allocation3], 1 }
  0xbd   :  { %365 = vsyncpa [#allocation3 + $0x1], 1 }

// kernel: generator_forward.2
= control target key start
LH: loop header
LB: loop body
LE: loop exit
PB: predicated region body
PF: predicated region fallthrough
CT: control target
= control target key end

     0   :  { %8 = vsyncpa [#allocation5], 0  ;;  %s767_s0 = inlined_call_operand.vmem [shape: bf16[16,32], index: 0, kind: input, shape index: {}]   ;;  %s768_s1 = inlined_call_operand.hbm [shape: bf16[32,512], index: 1, kind: input, shape index: {}]   ;;  %s769_s2 = inlined_call_operand.vmem [shape: f32[1,512], index: 2, kind: input, shape index: {}]   ;;  %s770_s3 = inlined_call_operand.vmem [shape: f32[16,1], index: 3, kind: output, shape index: {}]  }
   0x1   :  { %10 = vsyncpa [#allocation5 + $0x1], 0  ;;  %s643_s12 = smov 0   ;;  %s645_s13 = smov 0  }
   0x2   :  { %s647_s14 = smov 0   ;;  %s649_s15 = smov 0  }
   0x3   :  { %s651_s16 = smov 0   ;;  %s653_s17 = smov 0  }
   0x4   :  { %s655_s18 = smov 0   ;;  %s657_s19 = smov 0  }
   0x5 LB: > { %s409_s20 = sadd.s32 4294967295, %s615_s19   ;;  %s25_s21 = sadd.s32 1, %s607_s17  ;;  %s615_s19 = sphi %s657_s19, %s16_s19   ;;  %s611_s18 = sphi %s655_s18, %s779_s18   ;;  %s607_s17 = sphi %s653_s17, %s778_s17   ;;  %s603_s16 = sphi %s651_s16, %s777_s16   ;;  %s599_s15 = sphi %s649_s15, %s776_s15   ;;  %s595_s14 = sphi %s647_s14, %s775_s14   ;;  %s591_s13 = sphi %s645_s13, %s774_s13   ;;  %s587_s12 = sphi %s643_s12, %s773_s12  }
   0x6   : > { %p26_p0 = scmp.ge.s32.totalorder %s25_s21, 4  ;;  %s28_s22 = sadd.s32 1, %s611_s18 }
   0x7   : > { %s61_s23 = sadd.s32 1, %s595_s14  ;;  %p68_p1 = scmp.ne.s32.totalorder %s595_s14, %s591_s13 }
   0x8   : > { %s781_s21 = smov (%p26_p0, %s25_s21), 0  ;;  %s783_s22 = smov (!%p26_p0, %s28_s22), %s611_s18 }
   0x9   : > { %s58_s24 = ssub.s32 %s607_s17, %s781_s21  ;;  %p69_p2 = scmp.eq.s32.totalorder %s615_s19, 0 }
   0xa   : > { %p30_p3 = scmp.ge.s32.totalorder %s783_s22, 2  ;;  %p59_p4 = scmp.eq.s32.totalorder %s58_s24, 0 }
   0xb   : > { %p693_p5 = por %p69_p2, %p68_p1  ;;  %p74_p6 = scmp.ne.s32.totalorder %s591_s13, %s587_s12 }
   0xc   : > { %s785_s22 = smov (%p30_p3, %s783_s22), 0  ;;  %p75_p7 = scmp.eq.s32.totalorder %s409_s20, 0 }
   0xd   : > { %s701_s26 = scalar_select %p59_p4, %s595_s14, %s61_s23  }
   0xe   : > { %p440_p8 = scmp.lt.s32.totalorder %s615_s19, 8  ;;  %s157_s27 = sand.u32 1, %s595_s14  }
   0xf   : > { %p705_p9 = por %p75_p7, %p74_p6  ;;  %s413_s29 = sshll.u32 %s157_s27, 4 }
  0x10   : > { %s414_s30 = sshll.u32 %s607_s17, 2  ;;  %s161_s8 = scalar_lea.vmem [#allocation4], %s413_s29 }
  0x11   : > { %s165_s6 = scalar_lea.hbm %s768_s1, %s414_s30  ;;  %s168_s9 = sshll.u32 %s161_s8, 4  ;;  %s169_s9 = int_to_ptr.vmem [resolvable:$true] %s168_s9 }
  0x12   : > { %s166_s7 = sshll.u32 %s165_s6, 4  ;;  %p437_p10 = pnand %p440_p8, %p693_p5  ;;  %s167_s7 = int_to_ptr.hbm [resolvable:$true] %s166_s7 }
  0x13   : > { %p415_p11 = scmp.ge.s32.totalorder %s615_s19, 1  ;;  %s158_s10 = scalar_lea.sflag [#allocation5], %s157_s27 }
  0x14   : > { %s617_s11 = smov 256   ;;  %s618_s12 = smov 64  }
  0x15   : > { %s619_s20 = smov 4   ;;  %p182_p12 = scmp.lt.s32.totalorder %s615_s19, 9 }
  0x16   : > { %439 = dma.hbm_to_vmem [thread:$0]  (!%p437_p10), %s167_s7, 256, %s169_s9, %s158_s10, %s617_s11, %s618_s12, %s619_s20  }
  0x17   : > { %p183_p13 = pnand %p415_p11, %p182_p12 }
  0x18   : > { %s188_s23 = sand.u32 (!%p183_p13), 1, %s591_s13  }
  0x19   : > { %186 = sbr.rel (%p183_p13) target bundleno = 563 (0x233), region = 32  ;;  %s416_s24 = sshll.u32 (!%p183_p13), %s188_s23, 4 }
  0x1a   : > { %s189_s30 = scalar_lea.sflag (!%p183_p13), [#allocation5], %s188_s23  ;;  %s192_s29 = scalar_lea.vmem (!%p183_p13), [#allocation4], %s416_s24 }
  0x1e   : > { %582 = dma.done.wait (%p705_p9), %s189_s30, 256  }
  0x1f   : > { %584 = vsyncadd (%p705_p9), %s189_s30, 4294967040  ;;  %p222_p0 = scmp.lt.s32.totalorder %s603_s16, 1  ;;  %p226_p1 = scmp.lt.s32.totalorder %s599_s15, 3 }
  0x20   : > { %p419_p2 = scmp.ne.s32.totalorder %s599_s15, 0 }
  0x21   : > { %s787_s16 = smov (!%p222_p0, %s603_s16), 1 }
  0x22   : > { %s227_s25 = scalar_select %p226_p1, %s599_s15, 3 }
  0x23   : > { %s417_s27 = sshll.u32 %s787_s16, 2  ;;  %s418_s4 = sshll.u32 %s787_s16, 3 }
  0x24   : > { %s225_s7 = scalar_lea.vmem %s767_s0, %s417_s27  ;;  %s228_s10 = scalar_lea.vmem %s769_s2, %s227_s25 }
  0x25   : > { %s735_s12 = scalar_lea.vmem %s770_s3, %s418_s4  ;;  %237 = sbr.rel (%p419_p2) target bundleno = 45 (0x2d), region = 40 }
  0x2a   : > { %vm238_vm0 = vcmask 7168   ;;  %v620_v0 = vmov -inf   ;;  %v621_v1 = vmov 0.0  }
  0x2b   : > { %239 = vst.msk [vmem:[#allocation2] sm:$0xff] %vm238_vm0, %v620_v0 }
  0x2c   : > { %240 = vst.msk [vmem:[#allocation3] sm:$0xff] %vm238_vm0, %v621_v1 }
  0x2d PF: > { %v433_v2 = vld [vmem:[%s192_s29 + $0x8] sm:$0xff]  ;;  %v432_v3 = vld [vmem:[%s192_s29] sm:$0xff]  ;;  %vm262_vm1 = vcmask 261120   ;;  %v622_v9 = vmov 0   ;;  %vm299_vm2 = vcmask 7168   ;;  %p429_p3 = scmp.ne.s32.totalorder %s599_s15, 3 }
  0x2e   : > { %272 = vmatpush.bf16.msra.mxu0 %v433_v2  ;;  %v241_v4 = vld [vmem:[%s225_s7] sm:$0xf]  ;;  %511 = vset.pattern.permute.xlu0 %v622_v9 }
  0x2f   : > { %v512_v5 = vld [vmem:[%s228_s10] ss:$0 sm:$0xff] }
  0x32   : > { %273 = vmatpush.bf16.msra.mxu0 %v432_v3  ;;  %v279_v10 = vld [vmem:[#allocation2] sm:$0xff] }
  0x33   : > { %v286_v20 = vld [vmem:[#allocation3] sm:$0xff] }
  0x35   : > { %428 = vmatmul.msk.bf16.vlgmr.msra.gmra.mxu0 %vm262_vm1, %v241_v4 }
  0xb2   : > { %v275_v6 = vpop.f32.mrf.mxu0 }
  0xb3   : > { %v276_v7 = vadd.f32 %v512_v5, %v275_v6 }
  0xb5   : > { %280 = vmax.xlane.f32.xlu0 %v276_v7 }
  0xba   : > { %v277_v8 = vpop.f32.mrf.mxu0 }
 0x128   : > { %v281_v11 = vpop.xlane.xlu0 %280 }
 0x129   : > { %v282_v12 = vmax.f32 %v279_v10, %v281_v11 }
 0x12b   : > { %v283_v13 = vsub.f32 %v279_v10, %v282_v12  ;;  %301 = vst.msk [vmem:[#allocation2] sm:$0xff] %vm299_vm2, %v282_v12  ;;  %290 = vperm.xlu0 %511, %v282_v12  }
 0x12d   : > { %v284_v18 = vmul.f32 1.442695, %v283_v13 }
 0x19d   : > { %v291_v14 = vpop.permute.xlu0 %290 }
 0x19e   : > { %v293_v15 = vsub.f32 %v276_v7, %v291_v14 }
 0x1a0   : > { %v294_v16 = vmul.f32 1.442695, %v293_v15 }
 0x1a2   : > { %513 = vpow2.f32 %v294_v16 }
 0x1a3   : > { %515 = vpow2.f32 %v284_v18 }
 0x1a8   : > { %v514_v17 = vpop.eup %513 }
 0x1a9   : > { %296 = vadd.xlane.f32.xlu1 %v514_v17  ;;  %v516_v19 = vpop.eup %515 }
 0x1aa   : > { %v287_v21 = vmul.f32 %v516_v19, %v286_v20 }
 0x21b   : > { %305 = sbr.rel (%p429_p3) target bundleno = 563 (0x233), region = 44 }
 0x21c   : > { %v297_v22 = vpop.xlane.xlu1 %296 }
 0x21d   : > { %v298_v23 = vadd.f32 %v297_v22, %v287_v21 }
 0x21f   : > { %300 = vst.msk [vmem:[#allocation3] sm:$0xff] %vm299_vm2, %v298_v23 }
 0x220   : > { %v306_v26 = vld [vmem:[#allocation2] sm:$0xff] }
 0x226   : > { %v307_v24 = vld [vmem:[#allocation3] sm:$0xff] }
 0x227   : > { %517 = vlog2.f32 %v307_v24 }
 0x22d   : > { %v518_v25 = vpop.eup %517 }
 0x22e   : > { %v309_v27 = vmul.f32 0.6931472, %v518_v25 }
 0x230   : > { %v310_v28 = vadd.f32 %v309_v27, %v306_v26 }
 0x232   : > { %311 = vst.msk [vmem:[%s735_s12] sm:$0xff] %vm299_vm2, %v310_v28 }
 0x233 PF: > { %s16_s19 = sadd.s32 1, %s615_s19   ;;  %s773_s12 = smov %s591_s13 }
 0x234   : > { %p13_p4 = scmp.ge.s32.totalorder %s16_s19, 10   ;;  %s774_s13 = smov %s595_s14 }
 0x235   : > { %s775_s14 = smov %s701_s26  ;;  %s776_s15 = smov %s607_s17 }
 0x236   : > { %s777_s16 = smov %s611_s18  ;;  %s778_s17 = smov %s781_s21 }
 0x237   : > { %s779_s18 = smov %s785_s22  ;;  %15 = sbr.rel (!%p13_p4) target bundleno = 5 (0x5), region = 86 }
 0x23c   :  { %331 = vsyncpa [#allocation5], 1 }
 0x23d   :  { %333 = vsyncpa [#allocation5 + $0x1], 1 }

</bundles_post_ra>
